<compile_context>
chip_gen: v7x
topology: tpu7x:2x2x1
jax: 0.10.0
libtpu: 0.0.40
codegen_flags: <defaults>
</compile_context>

<pallas_src>
import functools
import math

import jax
import jax.numpy as jnp
from jax.experimental import pallas as pl
from jax.experimental.pallas import tpu as pltpu

LANE = 128  # TPU lane width; padded feature width for all hidden carries / logits


# ----------------------------------------------------------------------------
# Layer-size construction, mirroring QNet.build_mlp_layers()
# ----------------------------------------------------------------------------
def build_mlp_layer_sizes(input_size, first_hidden_size, output_size, layer_min_size=16):
    sizes = []
    layer_in, layer_out = input_size, first_hidden_size
    while True:
        sizes.append((layer_in, layer_out))
        layer_in = layer_out
        layer_out = int(layer_out / 2)
        if layer_out <= layer_min_size:
            break
    sizes.append((layer_in, output_size))  # output layer (no ReLU after it)
    return sizes


# ----------------------------------------------------------------------------
# Deterministic parameter init (kaiming_uniform_ on weights, torch-default
# uniform on biases), mimicking QNet.init_weights().  Stored as (in, out) f32.
# ----------------------------------------------------------------------------
def init_params(key, layer_sizes):
    params = []
    for (fan_in, fan_out) in layer_sizes:
        key, kw, kb = jax.random.split(key, 3)
        w_bound = math.sqrt(6.0 / fan_in)          # kaiming_uniform_ (a=0)
        b_bound = 1.0 / math.sqrt(fan_in)          # nn.Linear default bias init
        w = jax.random.uniform(kw, (fan_in, fan_out), jnp.float32, -w_bound, w_bound)
        b = jax.random.uniform(kb, (1, fan_out), jnp.float32, -b_bound, b_bound)
        params.append((w, b))
    return params


def _round_up(x, m):
    return ((x + m - 1) // m) * m


# ----------------------------------------------------------------------------
# Pack all layers into zero-padded resident slabs (done once per weight set).
# Zero padding keeps padded lanes identically zero through every layer — the
# fused action gather relies on this invariant.
# ----------------------------------------------------------------------------
def pack_params(params):
    n_layers = len(params)
    assert n_layers >= 2
    widths = [w.shape[1] for (w, _) in params] + [w.shape[0] for (w, _) in params[1:]]
    pad = _round_up(max(widths + [LANE]), LANE)

    w0, b0 = params[0]
    in0 = w0.shape[0]
    w0p = jnp.zeros((in0, pad), jnp.bfloat16)
    w0p = w0p.at[:, :w0.shape[1]].set(w0.astype(jnp.bfloat16))

    wr = jnp.zeros((n_layers - 1, pad, pad), jnp.bfloat16)
    bb = jnp.zeros((n_layers, 1, pad), jnp.float32)
    bb = bb.at[0, :, :b0.shape[1]].set(b0)
    for i in range(1, n_layers):
        w, b = params[i]
        wr = wr.at[i - 1, :w.shape[0], :w.shape[1]].set(w.astype(jnp.bfloat16))
        bb = bb.at[i, :, :b.shape[1]].set(b)
    return w0p, wr, bb


# ----------------------------------------------------------------------------
# Kernel bodies
# ----------------------------------------------------------------------------
def _mlp_body(x_ref, w0_ref, wr_ref, b_ref, n_layers):
    # Layer 0: (TILE_B, in0) bf16 @ (in0, PAD) bf16 on the MXU, f32 accumulate.
    h = jnp.dot(x_ref[...], w0_ref[...], preferred_element_type=jnp.float32) + b_ref[0]
    h = jnp.maximum(h, 0.0)
    # Remaining layers, fully unrolled (static Python loop — keep it unrolled).
    for i in range(1, n_layers):
        h = jnp.dot(h.astype(jnp.bfloat16), wr_ref[i - 1],
                    preferred_element_type=jnp.float32) + b_ref[i]
        if i < n_layers - 1:          # hidden layers get ReLU; output layer does not
            h = jnp.maximum(h, 0.0)
    return h                           # (TILE_B, PAD) f32, padded lanes are zero


def _gather_rows(h, act_row):
    # q[0, j] = h[j, act[j]]  — one XLU transpose of the logits, then a
    # sublane-iota select + sublane reduce; result stays lane-dense (1, TILE_B).
    # Out-of-range / padded action indices select only zero-padded lanes -> 0.0.
    hT = jnp.transpose(h, (1, 0))                              # (PAD, TILE_B)
    row = jax.lax.broadcasted_iota(jnp.int32, hT.shape, 0)     # sublane index = action id
    sel = jnp.where(row == act_row, hT, 0.0)                   # act_row: (1, TILE_B)
    return jnp.sum(sel, axis=0, keepdims=True)                 # (1, TILE_B) f32


def _qnet_preds_kernel(x_ref, w0_ref, wr_ref, b_ref, out_ref, *, n_layers):
    out_ref[...] = _mlp_body(x_ref, w0_ref, wr_ref, b_ref, n_layers).astype(out_ref.dtype)


def _qnet_qvals_kernel(x_ref, w0_ref, wr_ref, b_ref, act_ref, q_ref, *, n_layers):
    h = _mlp_body(x_ref, w0_ref, wr_ref, b_ref, n_layers)
    q_ref[0] = _gather_rows(h, act_ref[0])


def _qnet_both_kernel(x_ref, w0_ref, wr_ref, b_ref, act_ref, preds_ref, q_ref, *, n_layers):
    h = _mlp_body(x_ref, w0_ref, wr_ref, b_ref, n_layers)
    preds_ref[...] = h.astype(preds_ref.dtype)
    q_ref[0] = _gather_rows(h, act_ref[0])


# ----------------------------------------------------------------------------
# Wrappers
# ----------------------------------------------------------------------------
def _tiling(B, tile_b=512):
    """Batch-tile selection: scale with B (default cap 512), but keep >= 2 grid
    steps whenever possible so v7x's two TensorCores both get work; prefer
    multiples of 128 rows (lane-dense transposed outputs), 16-row minimum for
    bf16 sublane packing."""
    half = pl.cdiv(B, 2)
    if half > 64:
        t = _round_up(half, 128)
    else:
        t = _round_up(max(half, 16), 16)
    t = min(tile_b, t)
    B_pad = _round_up(B, t)
    return t, B_pad


def _common_specs(tile_b, in0, n_layers, pad):
    x_spec = pl.BlockSpec((tile_b, in0), lambda i: (i, 0))
    # Constant index_maps -> weight slabs are fetched into VMEM once and reused.
    w0_spec = pl.BlockSpec((in0, pad), lambda i: (0, 0))
    wr_spec = pl.BlockSpec((n_layers - 1, pad, pad), lambda i: (0, 0, 0))
    b_spec = pl.BlockSpec((n_layers, 1, pad), lambda i: (0, 0, 0))
    return x_spec, w0_spec, wr_spec, b_spec


def _pad_rows(x, B_pad):
    B = x.shape[0]
    return x if B_pad == B else jnp.pad(x, ((0, B_pad - B), (0, 0)))


def _pack_actions(act_idxes, B_pad, tile_b):
    # Lane-dense layout: one (1, TILE_B) int32 row per grid step.
    act = act_idxes.astype(jnp.int32)
    if act.shape[0] != B_pad:
        act = jnp.pad(act, (0, B_pad - act.shape[0]))
    return act.reshape(B_pad // tile_b, 1, tile_b)


_PARALLEL = pltpu.CompilerParams(dimension_semantics=("parallel",))


def qnet_forward(x, packed, num_actions, tile_b=512):
    """Equivalent of QNet.forward(states) in 'mlp' mode: returns (B, num_actions) f32."""
    w0, wr, bb = packed
    n_layers, pad = bb.shape[0], bb.shape[2]
    B, in0 = x.shape
    tile_b, B_pad = _tiling(B, tile_b)
    xb = _pad_rows(x.astype(jnp.bfloat16), B_pad)   # bf16 x: half the input DMA

    x_spec, w0_spec, wr_spec, b_spec = _common_specs(tile_b, in0, n_layers, pad)
    preds_pad = pl.pallas_call(
        functools.partial(_qnet_preds_kernel, n_layers=n_layers),
        out_shape=jax.ShapeDtypeStruct((B_pad, pad), jnp.bfloat16),   # bf16 writeback
        grid=(B_pad // tile_b,),
        in_specs=[x_spec, w0_spec, wr_spec, b_spec],
        out_specs=pl.BlockSpec((tile_b, pad), lambda i: (i, 0)),
        compiler_params=_PARALLEL,
    )(xb, w0, wr, bb)
    return preds_pad[:B, :num_actions].astype(jnp.float32)


def qnet_qvals(x, packed, act_idxes, tile_b=512):
    """Equivalent of QNet.forward(states, for_actions=...): fused gather, (B, 1) f32."""
    w0, wr, bb = packed
    n_layers, pad = bb.shape[0], bb.shape[2]
    B, in0 = x.shape
    tile_b, B_pad = _tiling(B, tile_b)
    num_tiles = B_pad // tile_b
    xb = _pad_rows(x.astype(jnp.bfloat16), B_pad)
    act = _pack_actions(act_idxes, B_pad, tile_b)

    x_spec, w0_spec, wr_spec, b_spec = _common_specs(tile_b, in0, n_layers, pad)
    act_spec = pl.BlockSpec((1, 1, tile_b), lambda i: (i, 0, 0))
    q_spec = pl.BlockSpec((1, 1, tile_b), lambda i: (i, 0, 0))
    q_pad = pl.pallas_call(
        functools.partial(_qnet_qvals_kernel, n_layers=n_layers),
        out_shape=jax.ShapeDtypeStruct((num_tiles, 1, tile_b), jnp.float32),
        grid=(num_tiles,),
        in_specs=[x_spec, w0_spec, wr_spec, b_spec, act_spec],
        out_specs=q_spec,
        compiler_params=_PARALLEL,
    )(xb, w0, wr, bb, act)
    return q_pad.reshape(B_pad)[:B][:, None]


def qnet_forward_and_qvals(x, packed, num_actions, act_idxes, tile_b=512):
    """One launch returning (preds (B, num_actions) f32, qvals (B, 1) f32):
    the typical DQN-loss case, avoiding a second pass over x and the weights."""
    w0, wr, bb = packed
    n_layers, pad = bb.shape[0], bb.shape[2]
    B, in0 = x.shape
    tile_b, B_pad = _tiling(B, tile_b)
    num_tiles = B_pad // tile_b
    xb = _pad_rows(x.astype(jnp.bfloat16), B_pad)
    act = _pack_actions(act_idxes, B_pad, tile_b)

    x_spec, w0_spec, wr_spec, b_spec = _common_specs(tile_b, in0, n_layers, pad)
    act_spec = pl.BlockSpec((1, 1, tile_b), lambda i: (i, 0, 0))
    preds_pad, q_pad = pl.pallas_call(
        functools.partial(_qnet_both_kernel, n_layers=n_layers),
        out_shape=(jax.ShapeDtypeStruct((B_pad, pad), jnp.bfloat16),
                   jax.ShapeDtypeStruct((num_tiles, 1, tile_b), jnp.float32)),
        grid=(num_tiles,),
        in_specs=[x_spec, w0_spec, wr_spec, b_spec, act_spec],
        out_specs=(pl.BlockSpec((tile_b, pad), lambda i: (i, 0)),
                   pl.BlockSpec((1, 1, tile_b), lambda i: (i, 0, 0))),
        compiler_params=_PARALLEL,
    )(xb, w0, wr, bb, act)
    preds = preds_pad[:B, :num_actions].astype(jnp.float32)
    qvals = q_pad.reshape(B_pad)[:B][:, None]
    return preds, qvals


# ----------------------------------------------------------------------------
# Pure-JAX f32 reference for verification
# ----------------------------------------------------------------------------
def qnet_forward_ref(x, params):
    h = x
    for i, (w, b) in enumerate(params):
        h = h @ w + b
        if i < len(params) - 1:
            h = jnp.maximum(h, 0.0)
    return h


if __name__ == "__main__":
    key = jax.random.PRNGKey(0)

    # Small config consistent with the module:
    #   feat_processor.get_mlp_max_input_size() -> 32
    #   hyperparams['first_hidden_size']        -> 64
    #   all_possible_acts                       -> 8 actions
    batch = 200            # not a multiple of the tile -> exercises padded last block
    input_size = 32
    first_hidden_size = 64
    num_actions = 8

    layer_sizes = build_mlp_layer_sizes(input_size, first_hidden_size, num_actions)
    # -> [(32, 64), (64, 32), (32, 8)] : two hidden Linear+ReLU, one output Linear

    kp, kx, ka = jax.random.split(key, 3)
    params = init_params(kp, layer_sizes)
    packed = pack_params(params)
    x = jax.random.normal(kx, (batch, input_size), jnp.float32)
    act_idxes = jax.random.randint(ka, (batch,), 0, num_actions, jnp.int32)

    # forward(states) -> preds ; forward(states, for_actions=...) -> qvals
    preds = jax.block_until_ready(qnet_forward(x, packed, num_actions))
    qvals = jax.block_until_ready(qnet_qvals(x, packed, act_idxes))
    preds2, qvals2 = jax.block_until_ready(
        qnet_forward_and_qvals(x, packed, num_actions, act_idxes))

    ref = qnet_forward_ref(x, params)
    ref_q = jnp.take_along_axis(ref, act_idxes[:, None], axis=1)

    assert preds.shape == (batch, num_actions)
    assert qvals.shape == (batch, 1)
    assert preds2.shape == (batch, num_actions) and qvals2.shape == (batch, 1)
    # bf16 weights/activations on the MXU (and bf16 preds writeback) -> loosened
    # tolerance vs the f32 reference.
    assert jnp.allclose(preds, ref, rtol=5e-2, atol=5e-2), "preds mismatch vs reference"
    assert jnp.allclose(qvals, ref_q, rtol=5e-2, atol=5e-2), "qvals mismatch vs reference"
    assert jnp.allclose(preds2, ref, rtol=5e-2, atol=5e-2), "combined preds mismatch"
    assert jnp.allclose(qvals2, ref_q, rtol=5e-2, atol=5e-2), "combined qvals mismatch"

    print("KERNEL_OK")
</pallas_src>

<mosaic_0001>
module attributes {stable_mosaic.version = 11 : i64} {
  func.func @_qnet_preds_kernel(%arg0: i32, %arg1: memref<128x32xbf16, #tpu.memory_space<vmem>>, %arg2: memref<32x128xbf16, #tpu.memory_space<vmem>>, %arg3: memref<2x128x128xbf16, #tpu.memory_space<vmem>>, %arg4: memref<3x1x128xf32, #tpu.memory_space<vmem>>, %arg5: memref<128x128xbf16, #tpu.memory_space<vmem>>) attributes {dimension_semantics = [#tpu.dimension_semantics<parallel>], iteration_bounds = array<i64: 2>, scalar_prefetch = 0 : i64, scratch_operands = 0 : i64, tpu.core_type = #tpu.core_type<tc>, window_params = [{transform_indices = @transform_0, window_bounds = array<i64: 128, 32>}, {pipeline_mode = #tpu.pipeline_mode<synchronous>, transform_indices = @transform_1, window_bounds = array<i64: 32, 128>}, {pipeline_mode = #tpu.pipeline_mode<synchronous>, transform_indices = @transform_2, window_bounds = array<i64: 2, 128, 128>}, {pipeline_mode = #tpu.pipeline_mode<synchronous>, transform_indices = @transform_3, window_bounds = array<i64: 3, 1, 128>}, {transform_indices = @transform_4, window_bounds = array<i64: 128, 128>}]} {
    %c0 = arith.constant 0 : index
    %c0_0 = arith.constant 0 : index
    %0 = vector.load %arg1[%c0, %c0_0] : memref<128x32xbf16, #tpu.memory_space<vmem>>, vector<128x32xbf16>
    %c0_1 = arith.constant 0 : index
    %c0_2 = arith.constant 0 : index
    %1 = vector.load %arg2[%c0_1, %c0_2] : memref<32x128xbf16, #tpu.memory_space<vmem>>, vector<32x128xbf16>
    %cst = arith.constant dense<0.000000e+00> : vector<128x128xf32>
    %2 = tpu.matmul %0, %1, %cst {dimension_numbers = #tpu.dot_dimension_numbers<[1], [0], [0], [1], [0, 0, 1, 1], [], []>} : vector<128x32xbf16>, vector<32x128xbf16>, vector<128x128xf32> -> vector<128x128xf32>
    %c0_3 = arith.constant 0 : index
    %c0_4 = arith.constant 0 : index
    %c0_5 = arith.constant 0 : index
    %3 = vector.load %arg4[%c0_3, %c0_4, %c0_5] : memref<3x1x128xf32, #tpu.memory_space<vmem>>, vector<1x1x128xf32>
    %4 = vector.shape_cast %3 : vector<1x1x128xf32> to vector<1x128xf32>
    %5 = vector.broadcast %4 : vector<1x128xf32> to vector<128x128xf32>
    %6 = arith.addf %2, %5 : vector<128x128xf32>
    %cst_6 = arith.constant 0.000000e+00 : f32
    %7 = vector.broadcast %cst_6 : f32 to vector<128x128xf32>
    %8 = arith.maximumf %6, %7 : vector<128x128xf32>
    %9 = arith.truncf %8 : vector<128x128xf32> to vector<128x128xbf16>
    %c0_7 = arith.constant 0 : index
    %c0_8 = arith.constant 0 : index
    %c0_9 = arith.constant 0 : index
    %10 = vector.load %arg3[%c0_7, %c0_8, %c0_9] : memref<2x128x128xbf16, #tpu.memory_space<vmem>>, vector<1x128x128xbf16>
    %11 = vector.shape_cast %10 : vector<1x128x128xbf16> to vector<128x128xbf16>
    %cst_10 = arith.constant dense<0.000000e+00> : vector<128x128xf32>
    %12 = tpu.matmul %9, %11, %cst_10 {dimension_numbers = #tpu.dot_dimension_numbers<[1], [0], [0], [1], [0, 0, 1, 1], [], []>} : vector<128x128xbf16>, vector<128x128xbf16>, vector<128x128xf32> -> vector<128x128xf32>
    %c1 = arith.constant 1 : index
    %c0_11 = arith.constant 0 : index
    %c0_12 = arith.constant 0 : index
    %13 = vector.load %arg4[%c1, %c0_11, %c0_12] : memref<3x1x128xf32, #tpu.memory_space<vmem>>, vector<1x1x128xf32>
    %14 = vector.shape_cast %13 : vector<1x1x128xf32> to vector<1x128xf32>
    %15 = vector.broadcast %14 : vector<1x128xf32> to vector<128x128xf32>
    %16 = arith.addf %12, %15 : vector<128x128xf32>
    %cst_13 = arith.constant 0.000000e+00 : f32
    %17 = vector.broadcast %cst_13 : f32 to vector<128x128xf32>
    %18 = arith.maximumf %16, %17 : vector<128x128xf32>
    %19 = arith.truncf %18 : vector<128x128xf32> to vector<128x128xbf16>
    %c1_14 = arith.constant 1 : index
    %c0_15 = arith.constant 0 : index
    %c0_16 = arith.constant 0 : index
    %20 = vector.load %arg3[%c1_14, %c0_15, %c0_16] : memref<2x128x128xbf16, #tpu.memory_space<vmem>>, vector<1x128x128xbf16>
    %21 = vector.shape_cast %20 : vector<1x128x128xbf16> to vector<128x128xbf16>
    %cst_17 = arith.constant dense<0.000000e+00> : vector<128x128xf32>
    %22 = tpu.matmul %19, %21, %cst_17 {dimension_numbers = #tpu.dot_dimension_numbers<[1], [0], [0], [1], [0, 0, 1, 1], [], []>} : vector<128x128xbf16>, vector<128x128xbf16>, vector<128x128xf32> -> vector<128x128xf32>
    %c2 = arith.constant 2 : index
    %c0_18 = arith.constant 0 : index
    %c0_19 = arith.constant 0 : index
    %23 = vector.load %arg4[%c2, %c0_18, %c0_19] : memref<3x1x128xf32, #tpu.memory_space<vmem>>, vector<1x1x128xf32>
    %24 = vector.shape_cast %23 : vector<1x1x128xf32> to vector<1x128xf32>
    %25 = vector.broadcast %24 : vector<1x128xf32> to vector<128x128xf32>
    %26 = arith.addf %22, %25 : vector<128x128xf32>
    %27 = arith.truncf %26 : vector<128x128xf32> to vector<128x128xbf16>
    %c0_20 = arith.constant 0 : index
    %c0_21 = arith.constant 0 : index
    %28 = vector.load %arg5[%c0_20, %c0_21] : memref<128x128xbf16, #tpu.memory_space<vmem>>, vector<128x128xbf16>
    tpu.vector_store %arg5[%c0_20, %c0_21], %27 {strides = array<i32>} : memref<128x128xbf16, #tpu.memory_space<vmem>>, vector<128x128xbf16>,
    return
  }
  func.func @transform_0(%arg0: i32) -> (i32, i32) {
    %c0_i32 = arith.constant 0 : i32
    %c0_i32_0 = arith.constant 0 : i32
    return %arg0, %c0_i32 : i32, i32
  }
  func.func @transform_1(%arg0: i32) -> (i32, i32) {
    %c0_i32 = arith.constant 0 : i32
    %c0_i32_0 = arith.constant 0 : i32
    %c0_i32_1 = arith.constant 0 : i32
    return %c0_i32, %c0_i32_0 : i32, i32
  }
  func.func @transform_2(%arg0: i32) -> (i32, i32, i32) {
    %c0_i32 = arith.constant 0 : i32
    %c0_i32_0 = arith.constant 0 : i32
    %c0_i32_1 = arith.constant 0 : i32
    %c0_i32_2 = arith.constant 0 : i32
    return %c0_i32, %c0_i32_0, %c0_i32_1 : i32, i32, i32
  }
  func.func @transform_3(%arg0: i32) -> (i32, i32, i32) {
    %c0_i32 = arith.constant 0 : i32
    %c0_i32_0 = arith.constant 0 : i32
    %c0_i32_1 = arith.constant 0 : i32
    %c0_i32_2 = arith.constant 0 : i32
    return %c0_i32, %c0_i32_0, %c0_i32_1 : i32, i32, i32
  }
  func.func @transform_4(%arg0: i32) -> (i32, i32) {
    %c0_i32 = arith.constant 0 : i32
    %c0_i32_0 = arith.constant 0 : i32
    return %arg0, %c0_i32 : i32, i32
  }
}

</mosaic_0001>

<bundles_post_ra>
// kernel: tpu_custom_call.1
= control target key start
LH: loop header
LB: loop body
LE: loop exit
PB: predicated region body
PF: predicated region fallthrough
CT: control target
= control target key end

     0   :  { %9 = vsyncpa [#allocation3], 0  ;;  %s1574_s0 = inlined_call_operand.vmem [shape: bf16[256,32], index: 0, kind: input, shape index: {}]   ;;  %s1575_s1 = inlined_call_operand.vmem [shape: bf16[32,128], index: 1, kind: input, shape index: {}]   ;;  %s1576_s2 = inlined_call_operand.vmem [shape: bf16[2,128,128], index: 2, kind: input, shape index: {}]   ;;  %s1577_s3 = inlined_call_operand.vmem [shape: f32[3,1,128], index: 3, kind: input, shape index: {}]   ;;  %s1578_s4 = inlined_call_operand.hbm [shape: bf16[256,128], index: 4, kind: output, shape index: {}]  }
   0x1   :  { %11 = vsyncpa [#allocation3 + $0x1], 0  ;;  %s1376_s15 = smov 0   ;;  %s1378_s16 = smov 0  }
   0x2   :  { %s1380_s17 = smov 0   ;;  %s1382_s18 = smov 0  }
   0x3 LB: > { %s1397_s19 = sadd.s32 4294967295, %s1346_s18   ;;  %s944_s20 = sadd.s32 4294967294, %s1346_s18   ;;  %s1346_s18 = sphi %s1382_s18, %s1584_s18   ;;  %s1342_s17 = sphi %s1380_s17, %s1583_s17   ;;  %s1338_s16 = sphi %s1378_s16, %s1582_s16   ;;  %s1334_s15 = sphi %s1376_s15, %s1581_s15  }
   0x4   : > { %s1401_s21 = sadd.s32 1, %s1346_s18   ;;  %s113_s22 = sadd.s32 1, %s1342_s17 }
   0x5   : > { %s110_s23 = ssub.s32 %s1346_s18, %s1401_s21  ;;  %p123_p0 = scmp.ne.s32.totalorder %s1342_s17, %s1338_s16 }
   0x6   : > { %p111_p1 = scmp.eq.s32.totalorder %s110_s23, 0  ;;  %p124_p2 = scmp.eq.s32.totalorder %s1397_s19, 1 }
   0x7   : > { %p129_p3 = scmp.ne.s32.totalorder %s1338_s16, %s1334_s15  ;;  %p130_p4 = scmp.eq.s32.totalorder %s944_s20, 1 }
   0x8   : > { %s1412_s24 = scalar_select %p111_p1, %s1342_s17, %s113_s22  }
   0x9   : > { %p1414_p5 = por %p124_p2, %p123_p0  ;;  %p1418_p6 = por %p130_p4, %p129_p3 }
   0xa   : > { %p947_p7 = scmp.ge.s32.totalorder %s1346_s18, 1  ;;  %p166_p8 = scmp.lt.s32.totalorder %s1346_s18, 3 }
   0xc   : > { %p167_p9 = pnand %p947_p7, %p166_p8 }
   0xd   : > { %v1258_v0 = vld [vmem:[%s1575_s1] sm:$0xff] (!%p167_p9)   ;;  %s949_s29 = sshll.u32 (!%p167_p9), %s1397_s19, 4  ;;  %v1259_v1 = vld [vmem:[%s1575_s1 + $0x8] sm:$0xff] (!%p167_p9)   ;;  %vm279_vm0 = vcmask (!%p167_p9), 261120   ;;  %v1270_v4 = vld [vmem:[%s1576_s2 + $0x10] sm:$0xff] (!%p167_p9)   ;;  %s189_s12 = sand.u32 (!%p167_p9), 1, %s1338_s16  }
   0xe   : > { %170 = sbr.rel (%p167_p9) target bundleno = 728 (0x2d8), region = 36  ;;  %p193_p10 = scmp.lt.s32.totalorder (!%p167_p9), %s949_s29, 31  ;;  %1133 = vmatprep.subr.bf16.mxu0 (!%p167_p9), %v1258_v0  ;;  %v1268_v2 = vld [vmem:[%s1576_s2] sm:$0xff] (!%p167_p9)   ;;  %v1269_v3 = vld [vmem:[%s1576_s2 + $0x8] sm:$0xff] (!%p167_p9)   ;;  %v1271_v8 = vld [vmem:[%s1576_s2 + $0x18] sm:$0xff] (!%p167_p9)  }
   0xf   : > { %1134 = vmatpush3.bf16.msra.mxu0 (!%p167_p9), %v1258_v0  ;;  %1153 = vmatprep.subr.bf16.mxu1 (!%p167_p9), %v1268_v2  ;;  %v1272_v9 = vld [vmem:[%s1576_s2 + $0x20] sm:$0xff] (!%p167_p9)   ;;  %v1273_v12 = vld [vmem:[%s1576_s2 + $0x28] sm:$0xff] (!%p167_p9)   ;;  %v1274_v16 = vld [vmem:[%s1576_s2 + $0x30] sm:$0xff] (!%p167_p9)   ;;  %s948_s20 = sshll.u32 (!%p167_p9), %s189_s12, 6  ;;  %s1043_s23 = sshll.u32 (!%p167_p9), %s1397_s19, 10 }
  0x10   : > { %1135 = vmatprep.subr.bf16.mxu0 (!%p167_p9), %v1259_v1  ;;  %1154 = vmatpush3.bf16.msra.mxu1 (!%p167_p9), %v1268_v2  ;;  %v1275_v17 = vld [vmem:[%s1576_s2 + $0x38] sm:$0xff] (!%p167_p9)   ;;  %v1276_v18 = vld [vmem:[%s1576_s2 + $0x40] sm:$0xff] (!%p167_p9)   ;;  %v1277_v19 = vld [vmem:[%s1576_s2 + $0x48] sm:$0xff] (!%p167_p9)   ;;  %s1512_s22 = scalar_lea.vmem (!%p167_p9), [#allocation2], %s948_s20  ;;  %s1525_s30 = scalar_lea.hbm (!%p167_p9), %s1578_s4, %s1043_s23 }
  0x11   : > { %1155 = vmatprep.subr.bf16.mxu1 (!%p167_p9), %v1269_v3  ;;  %v1278_v20 = vld [vmem:[%s1576_s2 + $0x50] sm:$0xff] (!%p167_p9)   ;;  %v1279_v21 = vld [vmem:[%s1576_s2 + $0x58] sm:$0xff] (!%p167_p9)   ;;  %v1280_v22 = vld [vmem:[%s1576_s2 + $0x60] sm:$0xff] (!%p167_p9)   ;;  %s882_s27 = sshll.u32 (!%p167_p9), %s1512_s22, 4  ;;  %s1533_s19 = scalar_lea.sflag (!%p167_p9), [#allocation3], %s189_s12  ;;  %s1527_s27 = int_to_ptr.vmem [resolvable:$true] %s882_s27 }
  0x12   : > { %v1281_v23 = vld [vmem:[%s1576_s2 + $0x68] sm:$0xff] (!%p167_p9)   ;;  %v951_v24 = vld [vmem:[%s1577_s3] ss:$0 sm:$0xff] (!%p167_p9)  ;;  %s1284_s5 = scalar_lea.vmem (!%p167_p9), %s1527_s27, 1024  ;;  %s1348_s6 = smov (!%p167_p9), [#allocation2]  }
  0x13   : > { %1136 = vmatpush3.bf16.msra.mxu0 (!%p167_p9), %v1259_v1  ;;  %p1285_p11 = scmp.ne.s32.totalorder (!%p167_p9), %s1527_s27, %s1284_s5  ;;  %s1288_s7 = sshll.u32 (!%p167_p9), %s1348_s6, 4  ;;  %s1289_s7 = int_to_ptr.vmem [resolvable:$false] %s1288_s7 }
  0x14   : > { %1156 = vmatpush3.bf16.msra.mxu1 (!%p167_p9), %v1269_v3  ;;  %1185 = vmatprep.subr.bf16.mxu0 (!%p167_p9), %v1276_v18  ;;  %s1290_s8 = scalar_lea.vmem (!%p167_p9), %s1289_s7, 2048  ;;  %p1291_p0 = scmp.lt.s32.totalorder (!%p167_p9), %s1527_s27, %s1289_s7 }
  0x15   : > { %s1586_s29 = smov (!%p193_p10, %s949_s29), 31  ;;  %1157 = vmatprep.subr.bf16.mxu1 %v1270_v4  ;;  %p1286_p12 = pnand %p1285_p11, %p1414_p5 }
  0x16   : > { %s950_s10 = sshll.u32 %s1586_s29, 2  ;;  %p1292_p1 = scmp.lt.s32.totalorder %s1290_s8, %s1284_s5 }
  0x17   : > { %s1440_s13 = scalar_lea.vmem %s1574_s0, %s950_s10  ;;  %p1287_p13 = pneg %p1286_p12 }
  0x18   : > { %v1260_v5 = vld [vmem:[%s1440_s13] sm:$0xff]   ;;  %v1261_v6 = vld [vmem:[%s1440_s13 + $0x8] sm:$0xff]   ;;  %v1262_v7 = vld [vmem:[%s1440_s13 + $0x10] sm:$0xff]   ;;  %1158 = vmatpush3.bf16.msra.mxu1 %v1270_v4  ;;  %p1293_p2 = por %p1292_p1, %p1291_p0 }
  0x19   : > { %1137 = vmatprep.mubr.msk.bf16.mxu0 %vm279_vm0, %v1260_v5  ;;  %v1263_v10 = vld [vmem:[%s1440_s13 + $0x18] sm:$0xff]   ;;  %1159 = vmatprep.subr.bf16.mxu1 %v1271_v8  ;;  %v1264_v11 = vld [vmem:[%s1440_s13 + $0x20] sm:$0xff]   ;;  %v1265_v13 = vld [vmem:[%s1440_s13 + $0x28] sm:$0xff]  }
  0x1a   : > { %1138 = vmatmul.mubr.msk.bf16.vlgmr.msra.gmra.mrb[0].mxu0 %vm279_vm0, %v1261_v6  ;;  %v1266_v14 = vld [vmem:[%s1440_s13 + $0x30] sm:$0xff]   ;;  %v1267_v15 = vld [vmem:[%s1440_s13 + $0x38] sm:$0xff]   ;;  %p1294_p3 = pnand %p1293_p2, %p1287_p13 }
  0x1b   : > { %1141 = vmatprep.mubr.msk.bf16.mxu0 %vm279_vm0, %v1262_v7  ;;  %1186 = vmatpush3.bf16.msra.mxu0 %v1276_v18  ;;  %v1283_v18 = vld [vmem:[%s1576_s2 + $0x78] sm:$0xff]  }
  0x1c   : > { %1160 = vmatpush3.bf16.msra.mxu1 %v1271_v8  ;;  %1187 = vmatprep.subr.bf16.mxu0 %v1277_v19 }
  0x1d   : > { %1161 = vmatprep.subr.bf16.mxu1 %v1272_v9 }
  0x1f   : > { %1188 = vmatpush3.bf16.msra.mxu0 %v1277_v19  ;;  %v971_v19 = vld [vmem:[%s1577_s3 + $0x1] ss:$0 sm:$0xff] }
  0x20   : > { %1162 = vmatpush3.bf16.msra.mxu1 %v1272_v9  ;;  %1189 = vmatprep.subr.bf16.mxu0 %v1278_v20 }
  0x21   : > { %1163 = vmatprep.subr.bf16.mxu1 %v1273_v12 }
  0x22   : > { %1142 = vmatmul.mubr.msk.bf16.gmra.mrb[4].mxu0 %vm279_vm0, %v1263_v10 }
  0x23   : > { %1145 = vmatprep.mubr.msk.bf16.mxu0 %vm279_vm0, %v1264_v11  ;;  %1190 = vmatpush3.bf16.msra.mxu0 %v1278_v20 }
  0x24   : > { %1164 = vmatpush3.bf16.msra.mxu1 %v1273_v12  ;;  %1191 = vmatprep.subr.bf16.mxu0 %v1279_v21 }
  0x25   : > { %1165 = vmatprep.subr.bf16.mxu1 %v1274_v16 }
  0x27   : > { %1192 = vmatpush3.bf16.msra.mxu0 %v1279_v21 }
  0x28   : > { %1166 = vmatpush3.bf16.msra.mxu1 %v1274_v16  ;;  %1193 = vmatprep.subr.bf16.mxu0 %v1280_v22 }
  0x29   : > { %1167 = vmatprep.subr.bf16.mxu1 %v1275_v17 }
  0x2a   : > { %1146 = vmatmul.mubr.msk.bf16.gmra.mrb[8].mxu0 %vm279_vm0, %v1265_v13 }
  0x2b   : > { %1149 = vmatprep.mubr.msk.bf16.mxu0 %vm279_vm0, %v1266_v14  ;;  %1194 = vmatpush3.bf16.msra.mxu0 %v1280_v22 }
  0x2c   : > { %1168 = vmatpush3.bf16.msra.mxu1 %v1275_v17  ;;  %1195 = vmatprep.subr.bf16.mxu0 %v1281_v23  ;;  %v1282_v17 = vld [vmem:[%s1576_s2 + $0x70] sm:$0xff]  }
  0x2f   : > { %1196 = vmatpush3.bf16.msra.mxu0 %v1281_v23 }
  0x30   : > { %1197 = vmatprep.subr.bf16.mxu0 %v1282_v17 }
  0x32   : > { %1150 = vmatmul.mubr.msk.bf16.gmra.mrb[12].mxu0 %vm279_vm0, %v1267_v15 }
  0x33   : > { %1198 = vmatpush3.bf16.msra.mxu0 %v1282_v17 }
  0x34   : > { %1199 = vmatprep.subr.bf16.mxu0 %v1283_v18 }
  0x37   : > { %1200 = vmatpush3.bf16.msra.mxu0 %v1283_v18 }
  0xed   : > { %v1139_v25 = vpop.f32.mrb[0].mxu0 }
  0xee   : > { %v347_v26 = vadd.f32 %v1139_v25, %v951_v24  ;;  %v338_v27 = vpop.f32.mrb[1].mxu0 }
  0xef   : > { %v339_v28 = vadd.f32 %v951_v24, %v338_v27  ;;  %v1140_v29 = vpop.f32.mrb[2].mxu0 }
  0xf0   : > { %v350_v30 = vadd.f32 %v1140_v29, %v951_v24  ;;  %v341_v31 = vpop.f32.mrb[3].mxu0  ;;  %v403_v33 = vmax.f32 %v347_v26, 0.0 }
  0xf1   : > { %v342_v32 = vadd.f32 %v951_v24, %v341_v31  ;;  %v401_v35 = vmax.f32 %v339_v28, 0.0 }
  0xf2   : > { %v404_v34 = vmax.f32 %v350_v30, 0.0 }
  0xf3   : > { %v402_v36 = vmax.f32 %v342_v32, 0.0 }
  0xf4   : > { %v418_v37 = vpack.c.bf16 %v404_v34, %v403_v33 }
  0xf5   : > { %v1143_v38 = vpop.f32.mrb[4].mxu0  ;;  %v417_v39 = vpack.c.bf16 %v402_v36, %v401_v35 }
  0xf6   : > { %v363_v40 = vadd.f32 %v1143_v38, %v951_v24  ;;  %v354_v41 = vpop.f32.mrb[5].mxu0 }
  0xf7   : > { %v355_v42 = vadd.f32 %v951_v24, %v354_v41  ;;  %v1144_v43 = vpop.f32.mrb[6].mxu0  ;;  %1169 = vmatprep.mubr.bf16.mxu1 %v417_v39 }
  0xf8   : > { %v366_v44 = vadd.f32 %v1144_v43, %v951_v24  ;;  %v357_v45 = vpop.f32.mrb[7].mxu0  ;;  %1170 = vmatmul.mubr.bf16.vlgmr.msra.gmra.mrb[0].mxu1 %v418_v37  ;;  %v407_v47 = vmax.f32 %v363_v40, 0.0 }
  0xf9   : > { %v358_v46 = vadd.f32 %v951_v24, %v357_v45  ;;  %v405_v49 = vmax.f32 %v355_v42, 0.0 }
  0xfa   : > { %v408_v48 = vmax.f32 %v366_v44, 0.0 }
  0xfb   : > { %v406_v50 = vmax.f32 %v358_v46, 0.0 }
  0xfc   : > { %v420_v51 = vpack.c.bf16 %v408_v48, %v407_v47 }
  0xfd   : > { %v419_v52 = vpack.c.bf16 %v406_v50, %v405_v49  ;;  %v1147_v53 = vpop.f32.mrb[8].mxu0 }
  0xfe   : > { %v379_v54 = vadd.f32 %v1147_v53, %v951_v24  ;;  %v370_v55 = vpop.f32.mrb[9].mxu0 }
  0xff   : > { %v371_v56 = vadd.f32 %v951_v24, %v370_v55  ;;  %v1148_v57 = vpop.f32.mrb[10].mxu0  ;;  %1173 = vmatprep.mubr.bf16.mxu1 %v419_v52 }
 0x100   : > { %v382_v58 = vadd.f32 %v1148_v57, %v951_v24  ;;  %v373_v59 = vpop.f32.mrb[11].mxu0  ;;  %1174 = vmatmul.mubr.bf16.gmra.mrb[4].mxu1 %v420_v51  ;;  %v411_v61 = vmax.f32 %v379_v54, 0.0 }
 0x101   : > { %v374_v60 = vadd.f32 %v951_v24, %v373_v59  ;;  %v409_v63 = vmax.f32 %v371_v56, 0.0 }
 0x102   : > { %v412_v62 = vmax.f32 %v382_v58, 0.0 }
 0x103   : > { %v410_v0 = vmax.f32 %v374_v60, 0.0 }
 0x104   : > { %v422_v1 = vpack.c.bf16 %v412_v62, %v411_v61 }
 0x105   : > { %v421_v2 = vpack.c.bf16 %v410_v0, %v409_v63  ;;  %v1151_v3 = vpop.f32.mrb[12].mxu0 }
 0x106   : > { %v395_v4 = vadd.f32 %v1151_v3, %v951_v24  ;;  %v386_v5 = vpop.f32.mrb[13].mxu0 }
 0x107   : > { %v387_v6 = vadd.f32 %v951_v24, %v386_v5  ;;  %v1152_v7 = vpop.f32.mrb[14].mxu0  ;;  %1177 = vmatprep.mubr.bf16.mxu1 %v421_v2 }
 0x108   : > { %v398_v8 = vadd.f32 %v1152_v7, %v951_v24  ;;  %v389_v9 = vpop.f32.mrb[15].mxu0  ;;  %1178 = vmatmul.mubr.bf16.gmra.mrb[8].mxu1 %v422_v1  ;;  %v415_v11 = vmax.f32 %v395_v4, 0.0 }
 0x109   : > { %v390_v10 = vadd.f32 %v951_v24, %v389_v9  ;;  %v413_v13 = vmax.f32 %v387_v6, 0.0 }
 0x10a   : > { %v416_v12 = vmax.f32 %v398_v8, 0.0 }
 0x10b   : > { %v414_v14 = vmax.f32 %v390_v10, 0.0 }
 0x10c   : > { %v424_v15 = vpack.c.bf16 %v416_v12, %v415_v11 }
 0x10d   : > { %v423_v16 = vpack.c.bf16 %v414_v14, %v413_v13  ;;  %v997_v13 = vld [vmem:[%s1577_s3 + $0x2] ss:$0 sm:$0xff] }
 0x10f   : > { %1181 = vmatprep.mubr.bf16.mxu1 %v423_v16 }
 0x110   : > { %1182 = vmatmul.mubr.bf16.gmra.mrb[12].mxu1 %v424_v15 }
 0x1cb   : > { %v1171_v20 = vpop.f32.mrb[0].mxu1 }
 0x1cc   : > { %v540_v21 = vadd.f32 %v1171_v20, %v971_v19  ;;  %v531_v22 = vpop.f32.mrb[1].mxu1 }
 0x1cd   : > { %v532_v23 = vadd.f32 %v971_v19, %v531_v22  ;;  %v1172_v24 = vpop.f32.mrb[2].mxu1 }
 0x1ce   : > { %v543_v25 = vadd.f32 %v1172_v24, %v971_v19  ;;  %v534_v26 = vpop.f32.mrb[3].mxu1  ;;  %v596_v28 = vmax.f32 %v540_v21, 0.0 }
 0x1cf   : > { %v535_v27 = vadd.f32 %v971_v19, %v534_v26  ;;  %v594_v30 = vmax.f32 %v532_v23, 0.0 }
 0x1d0   : > { %v597_v29 = vmax.f32 %v543_v25, 0.0 }
 0x1d1   : > { %v595_v31 = vmax.f32 %v535_v27, 0.0 }
 0x1d2   : > { %v611_v32 = vpack.c.bf16 %v597_v29, %v596_v28 }
 0x1d3   : > { %v610_v33 = vpack.c.bf16 %v595_v31, %v594_v30  ;;  %v1175_v34 = vpop.f32.mrb[4].mxu1 }
 0x1d4   : > { %v556_v35 = vadd.f32 %v1175_v34, %v971_v19  ;;  %v547_v36 = vpop.f32.mrb[5].mxu1 }
 0x1d5   : > { %v548_v37 = vadd.f32 %v971_v19, %v547_v36  ;;  %v1176_v38 = vpop.f32.mrb[6].mxu1  ;;  %1201 = vmatprep.mubr.bf16.mxu0 %v610_v33 }
 0x1d6   : > { %v559_v39 = vadd.f32 %v1176_v38, %v971_v19  ;;  %v550_v40 = vpop.f32.mrb[7].mxu1  ;;  %1202 = vmatmul.mubr.bf16.vlgmr.msra.gmra.mrb[16].mxu0 %v611_v32  ;;  %v600_v42 = vmax.f32 %v556_v35, 0.0 }
 0x1d7   : > { %v551_v41 = vadd.f32 %v971_v19, %v550_v40  ;;  %v598_v44 = vmax.f32 %v548_v37, 0.0 }
 0x1d8   : > { %v601_v43 = vmax.f32 %v559_v39, 0.0 }
 0x1d9   : > { %v599_v45 = vmax.f32 %v551_v41, 0.0 }
 0x1da   : > { %v613_v46 = vpack.c.bf16 %v601_v43, %v600_v42 }
 0x1db   : > { %v612_v47 = vpack.c.bf16 %v599_v45, %v598_v44  ;;  %v1179_v48 = vpop.f32.mrb[8].mxu1 }
 0x1dc   : > { %v572_v49 = vadd.f32 %v1179_v48, %v971_v19  ;;  %v563_v50 = vpop.f32.mrb[9].mxu1 }
 0x1dd   : > { %v564_v51 = vadd.f32 %v971_v19, %v563_v50  ;;  %v1180_v52 = vpop.f32.mrb[10].mxu1  ;;  %1205 = vmatprep.mubr.bf16.mxu0 %v612_v47 }
 0x1de   : > { %v575_v53 = vadd.f32 %v1180_v52, %v971_v19  ;;  %v566_v54 = vpop.f32.mrb[11].mxu1  ;;  %1206 = vmatmul.mubr.bf16.gmra.mrb[20].mxu0 %v613_v46  ;;  %v604_v56 = vmax.f32 %v572_v49, 0.0 }
 0x1df   : > { %v567_v55 = vadd.f32 %v971_v19, %v566_v54  ;;  %v602_v58 = vmax.f32 %v564_v51, 0.0 }
 0x1e0   : > { %v605_v57 = vmax.f32 %v575_v53, 0.0 }
 0x1e1   : > { %v603_v59 = vmax.f32 %v567_v55, 0.0 }
 0x1e2   : > { %v615_v60 = vpack.c.bf16 %v605_v57, %v604_v56 }
 0x1e3   : > { %v614_v61 = vpack.c.bf16 %v603_v59, %v602_v58  ;;  %v1183_v62 = vpop.f32.mrb[12].mxu1 }
 0x1e4   : > { %v588_v63 = vadd.f32 %v1183_v62, %v971_v19  ;;  %v579_v0 = vpop.f32.mrb[13].mxu1 }
 0x1e5   : > { %v580_v1 = vadd.f32 %v971_v19, %v579_v0  ;;  %v1184_v2 = vpop.f32.mrb[14].mxu1  ;;  %1209 = vmatprep.mubr.bf16.mxu0 %v614_v61 }
 0x1e6   : > { %v591_v3 = vadd.f32 %v1184_v2, %v971_v19  ;;  %v582_v4 = vpop.f32.mrb[15].mxu1  ;;  %1210 = vmatmul.mubr.bf16.gmra.mrb[24].mxu0 %v615_v60  ;;  %v608_v6 = vmax.f32 %v588_v63, 0.0 }
 0x1e7   : > { %v583_v5 = vadd.f32 %v971_v19, %v582_v4  ;;  %v606_v8 = vmax.f32 %v580_v1, 0.0 }
 0x1e8   : > { %v609_v7 = vmax.f32 %v591_v3, 0.0 }
 0x1e9   : > { %v607_v9 = vmax.f32 %v583_v5, 0.0 }
 0x1ea   : > { %v617_v10 = vpack.c.bf16 %v609_v7, %v608_v6 }
 0x1eb   : > { %v616_v11 = vpack.c.bf16 %v607_v9, %v606_v8 }
 0x1ed   : > { %1213 = vmatprep.mubr.bf16.mxu0 %v616_v11 }
 0x1ee   : > { %1214 = vmatmul.mubr.bf16.gmra.mrb[28].mxu0 %v617_v10 }
 0x2a9   : > { %v1203_v12 = vpop.f32.mrb[16].mxu0 }
 0x2aa   : > { %v725_v14 = vpop.f32.mrb[17].mxu0  ;;  %v734_v16 = vadd.f32 %v1203_v12, %v997_v13 }
 0x2ab   : > { %v1204_v15 = vpop.f32.mrb[18].mxu0  ;;  %v726_v19 = vadd.f32 %v997_v13, %v725_v14 }
 0x2ac   : > { %v737_v17 = vadd.f32 %v1204_v15, %v997_v13  ;;  %v728_v18 = vpop.f32.mrb[19].mxu0 }
 0x2ad   : > { %v729_v20 = vadd.f32 %v997_v13, %v728_v18 }
 0x2ae   : > { %v1052_v21 = vpack.c.bf16 %v737_v17, %v734_v16 }
 0x2af   : > { %v1047_v22 = vpack.c.bf16 %v729_v20, %v726_v19 }
 0x2b0   : > { %1084 = vst [vmem:[%s1512_s22 + $0x8] sm:$0xff] %v1052_v21  }
 0x2b1   : > { %1048 = vst [vmem:[%s1512_s22] sm:$0xff] %v1047_v22   ;;  %v1207_v23 = vpop.f32.mrb[20].mxu0 }
 0x2b2   : > { %v741_v24 = vpop.f32.mrb[21].mxu0  ;;  %v750_v26 = vadd.f32 %v1207_v23, %v997_v13 }
 0x2b3   : > { %v1208_v25 = vpop.f32.mrb[22].mxu0  ;;  %v742_v29 = vadd.f32 %v997_v13, %v741_v24 }
 0x2b4   : > { %v753_v27 = vadd.f32 %v1208_v25, %v997_v13  ;;  %v744_v28 = vpop.f32.mrb[23].mxu0 }
 0x2b5   : > { %v745_v30 = vadd.f32 %v997_v13, %v744_v28 }
 0x2b6   : > { %v1062_v31 = vpack.c.bf16 %v753_v27, %v750_v26 }
 0x2b7   : > { %v1057_v32 = vpack.c.bf16 %v745_v30, %v742_v29 }
 0x2b8   : > { %1086 = vst [vmem:[%s1512_s22 + $0x18] sm:$0xff] %v1062_v31  }
 0x2b9   : > { %1085 = vst [vmem:[%s1512_s22 + $0x10] sm:$0xff] %v1057_v32   ;;  %v1211_v33 = vpop.f32.mrb[24].mxu0 }
 0x2ba   : > { %v757_v34 = vpop.f32.mrb[25].mxu0  ;;  %v766_v36 = vadd.f32 %v1211_v33, %v997_v13 }
 0x2bb   : > { %v1212_v35 = vpop.f32.mrb[26].mxu0  ;;  %v758_v39 = vadd.f32 %v997_v13, %v757_v34 }
 0x2bc   : > { %v769_v37 = vadd.f32 %v1212_v35, %v997_v13  ;;  %v760_v38 = vpop.f32.mrb[27].mxu0 }
 0x2bd   : > { %v761_v40 = vadd.f32 %v997_v13, %v760_v38 }
 0x2be   : > { %v1072_v41 = vpack.c.bf16 %v769_v37, %v766_v36 }
 0x2bf   : > { %v1067_v42 = vpack.c.bf16 %v761_v40, %v758_v39 }
 0x2c0   : > { %1088 = vst [vmem:[%s1512_s22 + $0x28] sm:$0xff] %v1072_v41  }
 0x2c1   : > { %1087 = vst [vmem:[%s1512_s22 + $0x20] sm:$0xff] %v1067_v42   ;;  %v1215_v43 = vpop.f32.mrb[28].mxu0 }
 0x2c2   : > { %v773_v44 = vpop.f32.mrb[29].mxu0  ;;  %v782_v46 = vadd.f32 %v1215_v43, %v997_v13 }
 0x2c3   : > { %v1216_v45 = vpop.f32.mrb[30].mxu0  ;;  %v774_v49 = vadd.f32 %v997_v13, %v773_v44 }
 0x2c4   : > { %v785_v47 = vadd.f32 %v1216_v45, %v997_v13  ;;  %v776_v48 = vpop.f32.mrb[31].mxu0 }
 0x2c5   : > { %v777_v50 = vadd.f32 %v997_v13, %v776_v48 }
 0x2c6   : > { %v1082_v51 = vpack.c.bf16 %v785_v47, %v782_v46 }
 0x2c7   : > { %v1077_v52 = vpack.c.bf16 %v777_v50, %v774_v49 }
 0x2c8   : > { %1090 = vst [vmem:[%s1512_s22 + $0x38] sm:$0xff] %v1082_v51  }
 0x2c9   : > { %1089 = vst [vmem:[%s1512_s22 + $0x30] sm:$0xff] %v1077_v52  }
 0x2ca   : > { %1297 = shalt.err (!%p1294_p3)
}
 0x2cb   : > { %s1298_s9 = scalar_lea.hbm %s1525_s30, 1024  ;;  %s1302_s12 = scalar_lea.hbm %s1578_s4, 2048 }
 0x2cc   : > { %p1299_p4 = scmp.ne.s32.totalorder %s1525_s30, %s1298_s9  ;;  %p1303_p9 = scmp.lt.u32.totalorder %s1525_s30, %s1578_s4 }
 0x2cd   : > { %p1304_p10 = scmp.lt.u32.totalorder %s1302_s12, %s1298_s9  ;;  %p1306_p12 = scmp.lt.u32.totalorder %s1298_s9, %s1525_s30 }
 0x2ce   : > { %p1300_p7 = pnand %p1299_p4, %p1414_p5 }
 0x2cf   : > { %p1305_p11 = por %p1304_p10, %p1303_p9 }
 0x2d0   : > { %p1301_p8 = pneg %p1300_p7 }
 0x2d1   : > { %p1307_p13 = por %p1306_p12, %p1305_p11 }
 0x2d3   : > { %p1308_p0 = pnand %p1307_p13, %p1301_p8 }
 0x2d5   : > { %1311 = shalt.err (!%p1308_p0)
}
 0x2d6   : > { %s1349_s20 = smov 64   ;;  %s1350_s22 = smov 4  }
 0x2d7   : > { %1217 = dma.vmem_to_hbm [thread:$0]  (%p1414_p5), %s1527_s27, 1024, %s1525_s30, %s1533_s19, %s1349_s20, %s1349_s20, %s1350_s22  }
 0x2d8 PF: > { %p1223_p1 = scmp.ge.s32.totalorder %s1346_s18, 2  ;;  %s897_s23 = sand.u32 1, %s1334_s15  }
 0x2d9   : > { %s898_s28 = scalar_lea.sflag [#allocation3], %s897_s23 }
 0x2da   : > { %p1220_p2 = pnand %p1223_p1, %p1418_p6 }
 0x2dc   : > { %1329 = dma.done.wait (!%p1220_p2), %s898_s28, 1024  }
 0x2dd   : > { %1331 = vsyncadd (!%p1220_p2), %s898_s28, 4294966272  ;;  %p14_p3 = scmp.ge.s32.totalorder %s1401_s21, 4   ;;  %s1581_s15 = smov %s1338_s16 }
 0x2de   : > { %s1582_s16 = smov %s1342_s17  ;;  %s1583_s17 = smov %s1412_s24 }
 0x2df   : > { %s1584_s18 = smov %s1401_s21  ;;  %16 = sbr.rel (!%p14_p3) target bundleno = 3 (0x3), region = 74 }
 0x2e6   :  { %903 = vsyncpa [#allocation3], 1 }
 0x2e7   :  { %905 = vsyncpa [#allocation3 + $0x1], 1 }

</bundles_post_ra>
